<compile_context>
chip_gen: v7x
topology: tpu7x:2x2x1
jax: 0.10.0
libtpu: 0.0.40
codegen_flags: <defaults>
</compile_context>

<pallas_src>
import functools

import jax
import jax.numpy as jnp
from jax import lax
from jax.experimental import pallas as pl
from jax.experimental.pallas import tpu as pltpu

NUM_LABELS = 2


def _head_kernel(x0_ref, x1_ref, x2_ref, x3_ref, w_ref, b_ref, lbl_ref,
                 probs_ref, nll_ref, *, total_rows, tile_rows):
    # x*_ref : [TB, H]   activation dtype (f32 or bf16)
    # w_ref  : [4, H, NL] classifier weight (torch W.T split into 4 K-blocks)
    # b_ref  : [1, NL]   f32
    # lbl_ref: [TB, 1]   int32
    #
    # logits = concat(x0..x3) @ W + b, computed as a sum of 4 MXU matmuls
    # (fuses the torch.cat without materializing [B, 4H] anywhere).
    acc = jnp.dot(x0_ref[...], w_ref[0], preferred_element_type=jnp.float32)
    acc = acc + jnp.dot(x1_ref[...], w_ref[1], preferred_element_type=jnp.float32)
    acc = acc + jnp.dot(x2_ref[...], w_ref[2], preferred_element_type=jnp.float32)
    acc = acc + jnp.dot(x3_ref[...], w_ref[3], preferred_element_type=jnp.float32)
    logits = acc + b_ref[...]                                  # [TB, NL] f32

    # numerically-stable softmax / log-softmax over the label axis
    m = jnp.max(logits, axis=-1, keepdims=True)
    shifted = logits - m
    e = jnp.exp(shifted)                                       # EUP
    denom = jnp.sum(e, axis=-1, keepdims=True)
    inv = pl.reciprocal(denom, approx=True)                    # EUP, off VALU
    probs = e * inv
    log_probs = shifted - jnp.log(denom)                       # exact log

    # per-row NLL via one-hot select (labels in [0, NUM_LABELS))
    labels = lbl_ref[...]                                      # [TB, 1] int32
    cls_ids = lax.broadcasted_iota(jnp.int32, logits.shape, 1)
    picked = jnp.sum(jnp.where(cls_ids == labels, log_probs, 0.0),
                     axis=-1, keepdims=True)                   # [TB, 1]

    # mask rows of a ragged last tile out of the loss
    row = (lax.broadcasted_iota(jnp.int32, (tile_rows, 1), 0)
           + pl.program_id(0) * tile_rows)
    valid = row < total_rows

    nll_ref[...] = jnp.where(valid, -picked, 0.0)
    probs_ref[...] = probs.astype(probs_ref.dtype)


def question_matching_head(pooled, h_last, h_last2, h_last3, labels, w, b):
    """pooled/h_*: [B, H] (f32 or bf16) BERT outputs (pooled + CLS of last 3
    hidden states), labels: [B] or [B,1] int32, w: [4H, NL] (torch weight
    transposed), b: [NL].  Returns (mean CE loss scalar f32, probs [B, NL] f32)
    — i.e. the (loss, softmax(logits)) pair the PyTorch forward returns."""
    B, H = pooled.shape
    NL = NUM_LABELS

    w4 = w.reshape(4, H, NL)                 # free row-major view of [4H, NL]
    b2d = b.astype(jnp.float32).reshape(1, NL)      # cast once, not per tile
    labels2d = labels.reshape(B, 1).astype(jnp.int32)

    # batch tiling: bounds VMEM and enables a pipelined, megacore-parallel grid
    # for large B (256 rows x H f32 stays far under the scoped VMEM limit even
    # for BERT-large H=1024).
    TB = B if B <= 256 else 256
    num_tiles = pl.cdiv(B, TB)

    x_spec = pl.BlockSpec((TB, H), lambda i: (i, 0))
    kernel = functools.partial(_head_kernel, total_rows=B, tile_rows=TB)

    elt = pooled.dtype.itemsize
    cost = pl.CostEstimate(
        flops=2 * B * (4 * H) * NL + 8 * B * NL,
        transcendentals=B * (NL + 2),                       # exp, log, recip
        bytes_accessed=4 * B * H * elt + 4 * H * NL * w.dtype.itemsize
                       + B * NL * 4 + B * 4 + B * 4,
    )

    probs, nll = pl.pallas_call(
        kernel,
        out_shape=(
            jax.ShapeDtypeStruct((B, NL), jnp.float32),
            jax.ShapeDtypeStruct((B, 1), jnp.float32),
        ),
        grid=(num_tiles,),
        in_specs=[
            x_spec, x_spec, x_spec, x_spec,
            pl.BlockSpec((4, H, NL), lambda i: (0, 0, 0)),   # weight, resident
            pl.BlockSpec((1, NL), lambda i: (0, 0)),          # bias, resident
            pl.BlockSpec((TB, 1), lambda i: (i, 0)),          # labels
        ],
        out_specs=(
            pl.BlockSpec((TB, NL), lambda i: (i, 0)),
            pl.BlockSpec((TB, 1), lambda i: (i, 0)),
        ),
        compiler_params=pltpu.CompilerParams(
            dimension_semantics=("parallel",)),
        cost_estimate=cost,
    )(pooled, h_last, h_last2, h_last3, w4, b2d, labels2d)

    # mean CrossEntropy over the GLOBAL batch (partials summed in the wrapper
    # so the batch grid axis stays parallel across tiles / TCs).
    loss = jnp.sum(nll) / jnp.float32(B)
    return loss, probs


if __name__ == "__main__":
    key = jax.random.PRNGKey(0)
    B, H = 2, 32                      # small hidden size; 4H = 128 features
    F = 4 * H

    k1, k2, k3, k4, k5, k6, k7 = jax.random.split(key, 7)
    # synthetic "BERT outputs"
    pooled = jax.random.normal(k1, (B, H), dtype=jnp.float32)
    h_last = jax.random.normal(k2, (B, H), dtype=jnp.float32)
    h_last2 = jax.random.normal(k3, (B, H), dtype=jnp.float32)
    h_last3 = jax.random.normal(k4, (B, H), dtype=jnp.float32)
    labels = jax.random.randint(k5, (B,), 0, NUM_LABELS, dtype=jnp.int32)

    # deterministic classifier params (nn.Linear(4H, 2)); stored as W.T
    w = jax.random.normal(k6, (F, NUM_LABELS), dtype=jnp.float32) * (1.0 / jnp.sqrt(F))
    b = jax.random.normal(k7, (NUM_LABELS,), dtype=jnp.float32) * 0.01

    loss, probs = question_matching_head(pooled, h_last, h_last2, h_last3,
                                         labels, w, b)
    jax.block_until_ready((loss, probs))

    # reference in plain JAX (f32)
    last_cat = jnp.concatenate([pooled, h_last, h_last2, h_last3], axis=1)
    ref_logits = last_cat @ w + b
    ref_probs = jax.nn.softmax(ref_logits, axis=-1)
    ref_logp = jax.nn.log_softmax(ref_logits, axis=-1)
    ref_loss = -jnp.mean(jnp.take_along_axis(ref_logp, labels[:, None], axis=1))
    # probs use the EUP approx reciprocal (~2^-12 rel err) -> slightly looser atol
    assert jnp.allclose(probs, ref_probs, atol=2e-3), "probs mismatch"
    assert jnp.allclose(loss, ref_loss, atol=1e-5), "loss mismatch"

    # bf16 end-to-end path (what a bf16 backbone would feed): no f32 upcast at
    # the boundary, MXU accumulates in f32.
    loss16, probs16 = question_matching_head(
        pooled.astype(jnp.bfloat16), h_last.astype(jnp.bfloat16),
        h_last2.astype(jnp.bfloat16), h_last3.astype(jnp.bfloat16),
        labels, w.astype(jnp.bfloat16), b.astype(jnp.bfloat16))
    jax.block_until_ready((loss16, probs16))
    assert jnp.allclose(probs16, ref_probs, atol=1e-1), "bf16 probs mismatch"
    assert jnp.abs(loss16 - ref_loss) < 1e-1, "bf16 loss mismatch"

    print("KERNEL_OK")
</pallas_src>

<mosaic_0001>
module attributes {stable_mosaic.version = 11 : i64} {
  func.func @_head_kernel(%arg0: i32, %arg1: memref<2x32xf32, #tpu.memory_space<vmem>>, %arg2: memref<2x32xf32, #tpu.memory_space<vmem>>, %arg3: memref<2x32xf32, #tpu.memory_space<vmem>>, %arg4: memref<2x32xf32, #tpu.memory_space<vmem>>, %arg5: memref<4x32x2xf32, #tpu.memory_space<vmem>>, %arg6: memref<1x2xf32, #tpu.memory_space<vmem>>, %arg7: memref<2x1xi32, #tpu.memory_space<vmem>>, %arg8: memref<2x2xf32, #tpu.memory_space<vmem>>, %arg9: memref<2x1xf32, #tpu.memory_space<vmem>>) attributes {dimension_semantics = [#tpu.dimension_semantics<parallel>], iteration_bounds = array<i64: 1>, scalar_prefetch = 0 : i64, scratch_operands = 0 : i64, tpu.core_type = #tpu.core_type<tc>, window_params = [{transform_indices = @transform_0, window_bounds = array<i64: 2, 32>}, {transform_indices = @transform_1, window_bounds = array<i64: 2, 32>}, {transform_indices = @transform_2, window_bounds = array<i64: 2, 32>}, {transform_indices = @transform_3, window_bounds = array<i64: 2, 32>}, {pipeline_mode = #tpu.pipeline_mode<synchronous>, transform_indices = @transform_4, window_bounds = array<i64: 4, 32, 2>}, {pipeline_mode = #tpu.pipeline_mode<synchronous>, transform_indices = @transform_5, window_bounds = array<i64: 1, 2>}, {transform_indices = @transform_6, window_bounds = array<i64: 2, 1>}, {transform_indices = @transform_7, window_bounds = array<i64: 2, 2>}, {transform_indices = @transform_8, window_bounds = array<i64: 2, 1>}]} {
    %c0 = arith.constant 0 : index
    %c0_0 = arith.constant 0 : index
    %0 = vector.load %arg1[%c0, %c0_0] : memref<2x32xf32, #tpu.memory_space<vmem>>, vector<2x32xf32>
    %c0_1 = arith.constant 0 : index
    %c0_2 = arith.constant 0 : index
    %c0_3 = arith.constant 0 : index
    %1 = vector.load %arg5[%c0_1, %c0_2, %c0_3] : memref<4x32x2xf32, #tpu.memory_space<vmem>>, vector<1x32x2xf32>
    %2 = vector.shape_cast %1 : vector<1x32x2xf32> to vector<32x2xf32>
    %cst = arith.constant dense<0.000000e+00> : vector<2x2xf32>
    %3 = tpu.matmul %0, %2, %cst {dimension_numbers = #tpu.dot_dimension_numbers<[1], [0], [0], [1], [0, 0, 1, 1], [], []>} : vector<2x32xf32>, vector<32x2xf32>, vector<2x2xf32> -> vector<2x2xf32>
    %c0_4 = arith.constant 0 : index
    %c0_5 = arith.constant 0 : index
    %4 = vector.load %arg2[%c0_4, %c0_5] : memref<2x32xf32, #tpu.memory_space<vmem>>, vector<2x32xf32>
    %c1 = arith.constant 1 : index
    %c0_6 = arith.constant 0 : index
    %c0_7 = arith.constant 0 : index
    %5 = vector.load %arg5[%c1, %c0_6, %c0_7] : memref<4x32x2xf32, #tpu.memory_space<vmem>>, vector<1x32x2xf32>
    %6 = vector.shape_cast %5 : vector<1x32x2xf32> to vector<32x2xf32>
    %cst_8 = arith.constant dense<0.000000e+00> : vector<2x2xf32>
    %7 = tpu.matmul %4, %6, %cst_8 {dimension_numbers = #tpu.dot_dimension_numbers<[1], [0], [0], [1], [0, 0, 1, 1], [], []>} : vector<2x32xf32>, vector<32x2xf32>, vector<2x2xf32> -> vector<2x2xf32>
    %8 = arith.addf %3, %7 : vector<2x2xf32>
    %c0_9 = arith.constant 0 : index
    %c0_10 = arith.constant 0 : index
    %9 = vector.load %arg3[%c0_9, %c0_10] : memref<2x32xf32, #tpu.memory_space<vmem>>, vector<2x32xf32>
    %c2 = arith.constant 2 : index
    %c0_11 = arith.constant 0 : index
    %c0_12 = arith.constant 0 : index
    %10 = vector.load %arg5[%c2, %c0_11, %c0_12] : memref<4x32x2xf32, #tpu.memory_space<vmem>>, vector<1x32x2xf32>
    %11 = vector.shape_cast %10 : vector<1x32x2xf32> to vector<32x2xf32>
    %cst_13 = arith.constant dense<0.000000e+00> : vector<2x2xf32>
    %12 = tpu.matmul %9, %11, %cst_13 {dimension_numbers = #tpu.dot_dimension_numbers<[1], [0], [0], [1], [0, 0, 1, 1], [], []>} : vector<2x32xf32>, vector<32x2xf32>, vector<2x2xf32> -> vector<2x2xf32>
    %13 = arith.addf %8, %12 : vector<2x2xf32>
    %c0_14 = arith.constant 0 : index
    %c0_15 = arith.constant 0 : index
    %14 = vector.load %arg4[%c0_14, %c0_15] : memref<2x32xf32, #tpu.memory_space<vmem>>, vector<2x32xf32>
    %c3 = arith.constant 3 : index
    %c0_16 = arith.constant 0 : index
    %c0_17 = arith.constant 0 : index
    %15 = vector.load %arg5[%c3, %c0_16, %c0_17] : memref<4x32x2xf32, #tpu.memory_space<vmem>>, vector<1x32x2xf32>
    %16 = vector.shape_cast %15 : vector<1x32x2xf32> to vector<32x2xf32>
    %cst_18 = arith.constant dense<0.000000e+00> : vector<2x2xf32>
    %17 = tpu.matmul %14, %16, %cst_18 {dimension_numbers = #tpu.dot_dimension_numbers<[1], [0], [0], [1], [0, 0, 1, 1], [], []>} : vector<2x32xf32>, vector<32x2xf32>, vector<2x2xf32> -> vector<2x2xf32>
    %18 = arith.addf %13, %17 : vector<2x2xf32>
    %c0_19 = arith.constant 0 : index
    %c0_20 = arith.constant 0 : index
    %19 = vector.load %arg6[%c0_19, %c0_20] : memref<1x2xf32, #tpu.memory_space<vmem>>, vector<1x2xf32>
    %20 = vector.broadcast %19 : vector<1x2xf32> to vector<2x2xf32>
    %21 = arith.addf %18, %20 : vector<2x2xf32>
    %cst_21 = arith.constant dense<0xFF800000> : vector<2xf32>
    %22 = vector.multi_reduction <maximumf>, %21, %cst_21 [1] : vector<2x2xf32> to vector<2xf32>
    %23 = vector.shape_cast %22 : vector<2xf32> to vector<2x1xf32>
    %24 = vector.broadcast %23 : vector<2x1xf32> to vector<2x2xf32>
    %25 = arith.subf %21, %24 : vector<2x2xf32>
    %26 = math.exp %25 : vector<2x2xf32>
    %cst_22 = arith.constant dense<0.000000e+00> : vector<2xf32>
    %27 = vector.multi_reduction <add>, %26, %cst_22 [1] : vector<2x2xf32> to vector<2xf32>
    %28 = vector.shape_cast %27 : vector<2xf32> to vector<2x1xf32>
    %29 = tpu.reciprocal %28 {approx = true} : vector<2x1xf32> -> vector<2x1xf32>
    %30 = vector.broadcast %29 : vector<2x1xf32> to vector<2x2xf32>
    %31 = arith.mulf %26, %30 : vector<2x2xf32>
    %32 = math.log %28 : vector<2x1xf32>
    %33 = vector.broadcast %32 : vector<2x1xf32> to vector<2x2xf32>
    %34 = arith.subf %25, %33 : vector<2x2xf32>
    %c0_23 = arith.constant 0 : index
    %c0_24 = arith.constant 0 : index
    %35 = vector.load %arg7[%c0_23, %c0_24] : memref<2x1xi32, #tpu.memory_space<vmem>>, vector<2x1xi32>
    %36 = tpu.iota {dimensions = array<i32: 1>} : vector<2x2xi32>
    %37 = vector.broadcast %35 : vector<2x1xi32> to vector<2x2xi32>
    %38 = arith.cmpi eq, %36, %37 : vector<2x2xi32>
    %cst_25 = arith.constant 0.000000e+00 : f32
    %39 = vector.broadcast %cst_25 : f32 to vector<2x2xf32>
    %40 = arith.select %38, %34, %39 : vector<2x2xi1>, vector<2x2xf32>
    %cst_26 = arith.constant dense<0.000000e+00> : vector<2xf32>
    %41 = vector.multi_reduction <add>, %40, %cst_26 [1] : vector<2x2xf32> to vector<2xf32>
    %42 = vector.shape_cast %41 : vector<2xf32> to vector<2x1xf32>
    %43 = tpu.iota {dimensions = array<i32: 0>} : vector<2x1xi32>
    %c2_i32 = arith.constant 2 : i32
    %44 = arith.muli %arg0, %c2_i32 : i32
    %45 = vector.broadcast %44 : i32 to vector<2x1xi32>
    %46 = arith.addi %43, %45 : vector<2x1xi32>
    %c2_i32_27 = arith.constant 2 : i32
    %47 = vector.broadcast %c2_i32_27 : i32 to vector<2x1xi32>
    %48 = arith.cmpi slt, %46, %47 : vector<2x1xi32>
    %cst_28 = arith.constant 0.000000e+00 : f32
    %49 = vector.broadcast %cst_28 : f32 to vector<2x1xf32>
    %50 = arith.subf %49, %42 : vector<2x1xf32>
    %cst_29 = arith.constant 0.000000e+00 : f32
    %51 = vector.broadcast %cst_29 : f32 to vector<2x1xf32>
    %52 = arith.select %48, %50, %51 : vector<2x1xi1>, vector<2x1xf32>
    %c0_30 = arith.constant 0 : index
    %c0_31 = arith.constant 0 : index
    %53 = vector.load %arg9[%c0_30, %c0_31] : memref<2x1xf32, #tpu.memory_space<vmem>>, vector<2x1xf32>
    tpu.vector_store %arg9[%c0_30, %c0_31], %52 {strides = array<i32>} : memref<2x1xf32, #tpu.memory_space<vmem>>, vector<2x1xf32>,
    %c0_32 = arith.constant 0 : index
    %c0_33 = arith.constant 0 : index
    %54 = vector.load %arg8[%c0_32, %c0_33] : memref<2x2xf32, #tpu.memory_space<vmem>>, vector<2x2xf32>
    tpu.vector_store %arg8[%c0_32, %c0_33], %31 {strides = array<i32>} : memref<2x2xf32, #tpu.memory_space<vmem>>, vector<2x2xf32>,
    return
  }
  func.func @transform_0(%arg0: i32) -> (i32, i32) {
    %c0_i32 = arith.constant 0 : i32
    %c0_i32_0 = arith.constant 0 : i32
    return %arg0, %c0_i32 : i32, i32
  }
  func.func @transform_1(%arg0: i32) -> (i32, i32) {
    %c0_i32 = arith.constant 0 : i32
    %c0_i32_0 = arith.constant 0 : i32
    return %arg0, %c0_i32 : i32, i32
  }
  func.func @transform_2(%arg0: i32) -> (i32, i32) {
    %c0_i32 = arith.constant 0 : i32
    %c0_i32_0 = arith.constant 0 : i32
    return %arg0, %c0_i32 : i32, i32
  }
  func.func @transform_3(%arg0: i32) -> (i32, i32) {
    %c0_i32 = arith.constant 0 : i32
    %c0_i32_0 = arith.constant 0 : i32
    return %arg0, %c0_i32 : i32, i32
  }
  func.func @transform_4(%arg0: i32) -> (i32, i32, i32) {
    %c0_i32 = arith.constant 0 : i32
    %c0_i32_0 = arith.constant 0 : i32
    %c0_i32_1 = arith.constant 0 : i32
    %c0_i32_2 = arith.constant 0 : i32
    return %c0_i32, %c0_i32_0, %c0_i32_1 : i32, i32, i32
  }
  func.func @transform_5(%arg0: i32) -> (i32, i32) {
    %c0_i32 = arith.constant 0 : i32
    %c0_i32_0 = arith.constant 0 : i32
    %c0_i32_1 = arith.constant 0 : i32
    return %c0_i32, %c0_i32_0 : i32, i32
  }
  func.func @transform_6(%arg0: i32) -> (i32, i32) {
    %c0_i32 = arith.constant 0 : i32
    %c0_i32_0 = arith.constant 0 : i32
    return %arg0, %c0_i32 : i32, i32
  }
  func.func @transform_7(%arg0: i32) -> (i32, i32) {
    %c0_i32 = arith.constant 0 : i32
    %c0_i32_0 = arith.constant 0 : i32
    return %arg0, %c0_i32 : i32, i32
  }
  func.func @transform_8(%arg0: i32) -> (i32, i32) {
    %c0_i32 = arith.constant 0 : i32
    %c0_i32_0 = arith.constant 0 : i32
    return %arg0, %c0_i32 : i32, i32
  }
}

</mosaic_0001>

<bundles_post_ra>
// kernel: tpu_custom_call.1
= control target key start
LH: loop header
LB: loop body
LE: loop exit
PB: predicated region body
PF: predicated region fallthrough
CT: control target
= control target key end

     0   :  { %v552_v3 = vmov 0.0|0.0   ;;  %vm553_vm0 = vmmov 0   ;;  %v554_v11 = vmov 0.0   ;;  %s695_s0 = inlined_call_operand.vmem [shape: f32[2,32], index: 0, kind: input, shape index: {}]   ;;  %s696_s1 = inlined_call_operand.vmem [shape: f32[2,32], index: 1, kind: input, shape index: {}]   ;;  %s697_s2 = inlined_call_operand.vmem [shape: f32[2,32], index: 2, kind: input, shape index: {}]   ;;  %s698_s3 = inlined_call_operand.vmem [shape: f32[2,32], index: 3, kind: input, shape index: {}]   ;;  %s699_s4 = inlined_call_operand.vmem [shape: f32[4,32,2], index: 4, kind: input, shape index: {}]   ;;  %s700_s5 = inlined_call_operand.vmem [shape: f32[1,2], index: 5, kind: input, shape index: {}]   ;;  %s701_s6 = inlined_call_operand.vmem [shape: s32[2,1], index: 6, kind: input, shape index: {}]   ;;  %s702_s7 = inlined_call_operand.hbm [shape: f32[2,2], index: 7, kind: output, shape index: {0}]   ;;  %s703_s8 = inlined_call_operand.vmem [shape: f32[2,1], index: 8, kind: output, shape index: {1}]  }
   0x1   :  { %v410_v0 = vld [vmem:[%s699_s4 + $0x20] sm:$0xff]  ;;  %v411_v1 = vld [vmem:[%s699_s4 + $0x28] sm:$0xff]  ;;  %491 = vmatprep.subr.bf16.mxu0 %v552_v3  ;;  %497 = vmatprep.subr.bf16.mxu1 %v552_v3  ;;  %v412_v6 = vld [vmem:[%s699_s4 + $0x30] sm:$0xff] }
   0x2   :  { %v30_v2 = vld [vmem:[%s699_s4] sm:$0xff]  ;;  %v492_v4 = vpack.c.bf16 %v411_v1, %v410_v0  ;;  %v31_v5 = vld [vmem:[%s699_s4 + $0x8] sm:$0xff]  ;;  %v413_v7 = vld [vmem:[%s699_s4 + $0x38] sm:$0xff]  ;;  %455 = vmatprep.mubr.msk.f32.mxu0 %vm553_vm0, %v554_v11  ;;  %466 = vmatprep.mubr.msk.f32.mxu1 %vm553_vm0, %v554_v11 }
   0x3   :  { %v498_v8 = vpack.c.bf16 %v31_v5, %v30_v2  ;;  %v32_v9 = vld [vmem:[%s699_s4 + $0x10] sm:$0xff]  ;;  %v33_v10 = vld [vmem:[%s699_s4 + $0x18] sm:$0xff]  ;;  %v495_v12 = vpack.c.bf16 %v413_v7, %v412_v6  ;;  %v416_v14 = vld [vmem:[%s699_s4 + $0x40] sm:$0xff] }
   0x4   :  { %493 = vmatpush3.bf16.msra.mxu0 %v492_v4  ;;  %v501_v13 = vpack.c.bf16 %v33_v10, %v32_v9  ;;  %v417_v15 = vld [vmem:[%s699_s4 + $0x48] sm:$0xff]  ;;  %v421_v16 = vld [vmem:[%s699_s4 + $0x60] sm:$0xff] }
   0x5   :  { %499 = vmatpush3.bf16.msra.mxu1 %v498_v8  ;;  %494 = vmatprep.subr.bf16.mxu0 %v552_v3  ;;  %v422_v17 = vld [vmem:[%s699_s4 + $0x68] sm:$0xff] }
   0x6   :  { %500 = vmatprep.subr.bf16.mxu1 %v552_v3 }
   0x7   :  { %14 = vsyncpa [#allocation3], 0  ;;  %v34_v18 = vld [vmem:[%s696_s1] sm:$0x3]  ;;  %vm40_vm1 = vcmask 261120   ;;  %v504_v19 = vpack.c.bf16 %v417_v15, %v416_v14  ;;  %v510_v21 = vpack.c.bf16 %v422_v17, %v421_v16  ;;  %v418_v22 = vld [vmem:[%s699_s4 + $0x50] sm:$0xff]  ;;  %v371_v52 = vlaneseq }
   0x8   :  { %496 = vmatpush3.bf16.msra.mxu0 %v495_v12  ;;  %v29_v20 = vld [vmem:[%s695_s0] sm:$0x3]  ;;  %v419_v23 = vld [vmem:[%s699_s4 + $0x58] sm:$0xff]  ;;  %v423_v24 = vld [vmem:[%s699_s4 + $0x70] sm:$0xff]  ;;  %vm355_vm2 = vcmask 9216   ;;  %v555_v45 = vmov 0  }
   0x9   :  { %502 = vmatpush3.bf16.msra.mxu1 %v501_v13  ;;  %503 = vmatprep.subr.bf16.mxu0 %v552_v3  ;;  %v424_v25 = vld [vmem:[%s699_s4 + $0x78] sm:$0xff]  ;;  %v507_v26 = vpack.c.bf16 %v419_v23, %v418_v22  ;;  %v187_v28 = vld [vmem:[%s697_s2] sm:$0x3]  ;;  %v372_v53 = vand.u32 127, %v371_v52 }
   0xa   :  { %509 = vmatprep.subr.bf16.mxu1 %v552_v3  ;;  %v513_v27 = vpack.c.bf16 %v424_v25, %v423_v24  ;;  %v267_v29 = vld [vmem:[%s698_s3] sm:$0x3]  ;;  %520 = vset.pattern.permute.xlu1 %v555_v45 }
   0xb   :  { %456 = vmatmul.mubr.msk.f32.vlgmr.msra.gmra.mrb[0].mxu0 %vm40_vm1, %v34_v18  ;;  %v426_v40 = vld [vmem:[%s700_s5] ss:$0 sm:$0xff]  ;;  %521 = vset.pattern.permute.xlu0 %v555_v45  ;;  %s556_s5 = smov [#allocation2]  }
   0xc   :  { %467 = vmatmul.mubr.msk.f32.vlgmr.msra.gmra.mrb[0].mxu1 %vm40_vm1, %v29_v20  ;;  %505 = vmatpush3.bf16.msra.mxu0 %v504_v19  ;;  %v370_v44 = vld [vmem:[%s701_s6] sm:$0x3]  ;;  %s398_s6 = sshll.u32 %s556_s5, 4  ;;  %s399_s6 = int_to_ptr.vmem [resolvable:$true] %s398_s6 }
   0xd   :  { %511 = vmatpush3.bf16.msra.mxu1 %v510_v21  ;;  %506 = vmatprep.subr.bf16.mxu0 %v552_v3  ;;  %s528_s22 = scalar_lea.vmem %s399_s6, 32  ;;  %p533_p1 = scmp.lt.s32.totalorder %s399_s6, %s399_s6 }
   0xe   :  { %512 = vmatprep.subr.bf16.mxu1 %v552_v3  ;;  %477 = vmatprep.mubr.msk.f32.mxu0 %vm553_vm0, %v554_v11  ;;  %p529_p0 = scmp.ne.s32.totalorder %s399_s6, %s528_s22  ;;  %p534_p2 = scmp.lt.s32.totalorder %s528_s22, %s528_s22 }
   0xf   :  { %488 = vmatprep.mubr.msk.f32.mxu1 %vm553_vm0, %v554_v11  ;;  %374 = vperm.xlu1 %520, %v370_v44  }
  0x10   :  { %508 = vmatpush3.bf16.msra.mxu0 %v507_v26  ;;  %p535_p3 = por %p534_p2, %p533_p1 }
  0x11   :  { %514 = vmatpush3.bf16.msra.mxu1 %v513_v27 }
  0x12   :  { %p536_p4 = pnand %p535_p3, %p529_p0 }
  0x13   :  { %478 = vmatmul.mubr.msk.f32.vlgmr.msra.gmra.mrb[2].mxu0 %vm40_vm1, %v187_v28 }
  0x14   :  { %489 = vmatmul.mubr.msk.f32.vlgmr.msra.gmra.mrb[2].mxu1 %vm40_vm1, %v267_v29 }
  0x8e   :  { %v375_v55 = vpop.permute.xlu1 %374 }
  0x8f   :  { %vm376_vm3 = vcmp.eq.s32.totalorder %v372_v53, %v375_v55 }
  0xde   :  { %v110_v30 = vpop.f32.mrb[0].mxu0 }
  0xdf   :  { %v457_v31 = vpop.f32.mrb[1].mxu0  ;;  %v183_v32 = vpop.f32.mrb[0].mxu1 }
  0xe0   :  { %v184_v33 = vadd.f32 %v183_v32, %v110_v30  ;;  %v468_v34 = vpop.f32.mrb[1].mxu1 }
  0xe6   :  { %v262_v35 = vpop.f32.mrb[2].mxu0 }
  0xe7   :  { %v266_v36 = vadd.f32 %v262_v35, %v184_v33  ;;  %v479_v37 = vpop.f32.mrb[3].mxu0  ;;  %v342_v38 = vpop.f32.mrb[2].mxu1 }
  0xe8   :  { %v490_v39 = vpop.f32.mrb[3].mxu1 }
  0xe9   :  { %v346_v41 = vadd.f32 %v342_v38, %v266_v36 }
  0xeb   :  { %v354_v42 = vadd.f32 %v426_v40, %v346_v41 }
  0xed   :  { %v356_v43 = vsel %vm355_vm2, %v354_v42, -inf }
  0xee   :  { %357 = vmax.xlane.f32.xlu0 %v356_v43 }
 0x17b   :  { %v358_v46 = vpop.xlane.xlu0 %357 }
 0x17c   :  { %v359_v47 = vsub.f32 %v354_v42, %v358_v46 }
 0x17e   :  { %v360_v48 = vmul.f32 1.442695, %v359_v47 }
 0x180   :  { %522 = vpow2.f32 %v360_v48 }
 0x18a   :  { %v523_v49 = vpop.eup %522 }
 0x18b   :  { %v362_v50 = vsel %vm355_vm2, %v523_v49, 0.0 }
 0x18c   :  { %363 = vadd.xlane.f32.xlu0 %v362_v50 }
 0x219   :  { %v364_v51 = vpop.xlane.xlu0 %363 }
 0x21a   :  { %524 = vrcp.f32 %v364_v51 }
 0x21b   :  { %526 = vlog2.f32 %v364_v51 }
 0x224   :  { %v525_v54 = vpop.eup %524 }
 0x225   :  { %v527_v56 = vpop.eup %526  ;;  %v366_v57 = vmul.f32 %v525_v54, %v523_v49 }
 0x226   :  { %v368_v58 = vmul.f32 0.6931472, %v527_v56 }
 0x227   :  { %391 = vst.msk [vmem:[#allocation2] sm:$0x3] %vm355_vm2, %v366_v57 }
 0x228   :  { %v369_v59 = vsub.f32 %v359_v47, %v368_v58 }
 0x22a   :  { %v377_v60 = vsel %vm376_vm3, %v369_v59, 0.0 }
 0x22b   :  { %v378_v61 = vsel %vm355_vm2, %v377_v60, 0.0 }
 0x22c   :  { %379 = vadd.xlane.f32.xlu1 %v378_v61 }
 0x22d   :  { %539 = shalt.err (!%p536_p4)
}
 0x22e   :  { %s540_s25 = scalar_lea.hbm %s702_s7, 32 }
 0x22f   :  { %p541_p5 = scmp.ne.s32.totalorder %s702_s7, %s540_s25  ;;  %p544_p6 = scmp.lt.u32.totalorder %s540_s25, %s702_s7 }
 0x231   :  { %p546_p7 = pnand %p544_p6, %p541_p5 }
 0x233   :  { %549 = shalt.err (!%p546_p7)
}
 0x234   :  { %401 = dma.vmem_to_hbm [thread:$0]  %s399_s6, 32, %s702_s7, [#allocation3]   ;;  %v382_v62 = vshrl.u32 %v371_v52, 7  ;;  %vm389_vm5 = vcmask 1024  }
 0x236   :  { %vm386_vm4 = vcmp.lt.s32.totalorder %v382_v62, 2 }
 0x2b9   :  { %v380_v63 = vpop.xlane.xlu1 %379 }
 0x2ba   :  { %v387_v0 = vsub.f32 0.0, %v380_v63 }
 0x2bc   :  { %v388_v1 = vsel %vm386_vm4, %v387_v0, 0.0 }
 0x2bd   :  { %390 = vst.msk [vmem:[%s703_s8] sm:$0x3] %vm389_vm5, %v388_v1 }
 0x2be   :  { %550 = dma.done.wait [#allocation3], 32  }
 0x2bf   :  { %551 = vsyncadd [#allocation3], 4294967264 }
 0x2c0   :  { %409 = vsyncpa [#allocation3], 1 }

</bundles_post_ra>
